<compile_context>
chip_gen: v7x
topology: tpu7x:2x2x1
jax: 0.10.0
libtpu: 0.0.40
codegen_flags: <defaults>
</compile_context>

<pallas_src>
import functools

import jax
import jax.numpy as jnp
from jax.experimental import pallas as pl
from jax.experimental.pallas import tpu as pltpu


# ---------------------------------------------------------------------------
# Deterministic "config" weights (MCCD_Criterion.__init__ reads these from a
# config dict; fixed constants here, with three_bias_learner_exist=True).
# ---------------------------------------------------------------------------
LOSS_WEIGHTS = dict(
    major_loss_weight=1.0,
    distribution_loss_weight=0.5,
    euclidean_distance_fusion_q_weight=1.0 / 3.0,
    euclidean_distance_fusion_a_weight=1.0 / 3.0,
    euclidean_distance_fusion_v_weight=1.0 / 3.0,
    cycle_Kl_loss_weight=0.5,
    cycle_KL_a_q_weight=1.0 / 3.0,
    cycle_KL_q_v_weight=1.0 / 3.0,
    cycle_KL_v_a_weight=1.0 / 3.0,
)

_PAIRWISE_EPS = 1e-6  # torch.nn.PairwiseDistance default eps (added to the diff)


def _round_up(x, m):
    return (x + m - 1) // m * m


def _f32(x):
    # Trace-time no-op when inputs are already f32; bf16 inputs are upcast in
    # vregs (exp/log/sqrt want f32 anyway) -- HBM still moves the narrow dtype.
    return x if x.dtype == jnp.float32 else x.astype(jnp.float32)


def _log_softmax_parts(x):
    """Returns (log_softmax(x), exp(x - max), sum_exp): one exp pass, reused."""
    m = jnp.max(x, axis=-1, keepdims=True)
    xm = x - m
    e = jnp.exp(xm)
    s = jnp.sum(e, axis=-1, keepdims=True)
    return xm - jnp.log(s), e, s


def _mccd_kernel(label_ref, fusion_ref, q_ref, a_ref, v_ref, out_ref,
                 *, tb, batch, needs_row_mask, w):
    i = pl.program_id(0)

    fusion = _f32(fusion_ref[...])
    q = _f32(q_ref[...])
    a = _f32(a_ref[...])
    v = _f32(v_ref[...])
    labels = label_ref[...]                                   # (tb, 1) int32
    c = fusion.shape[-1]

    # Row-validity mask for the over-hanging last block (only emitted when
    # B % tb != 0).  All reductions are per-row first, then masked with a
    # select (NaN/Inf from garbage rows cannot propagate through a select).
    label_ok = (labels >= 0) & (labels < c)                   # (tb, 1) bool
    if needs_row_mask:
        row_ids = jax.lax.broadcasted_iota(jnp.int32, (tb, 1), 0) + i * tb
        row_valid = row_ids < batch
        label_ok = label_ok & row_valid

        def mask_rows(x):
            return jnp.where(row_valid, x, 0.0)
    else:
        def mask_rows(x):
            return x

    # ---- CrossEntropy from the raw fusion logits (no log_softmax tile) -----
    #   per-row CE = logsumexp(fusion) - fusion[row, label]
    m_f = jnp.max(fusion, axis=-1, keepdims=True)
    s_f = jnp.sum(jnp.exp(fusion - m_f), axis=-1, keepdims=True)
    lane_ids = jax.lax.broadcasted_iota(jnp.int32, (tb, c), 1)
    ce_mask = lane_ids == labels                              # (tb, c) bool
    gathered = jnp.sum(jnp.where(ce_mask, fusion, 0.0), axis=-1, keepdims=True)
    per_row_ce = (m_f + jnp.log(s_f)) - gathered              # (tb, 1)
    ce_sum = jnp.sum(jnp.where(label_ok, per_row_ce, 0.0))

    # ---- PairwiseDistance(p=2), per-modality weights folded per-row --------
    def pdist_rows(x, y):
        d = x - y + _PAIRWISE_EPS                 # torch adds eps to the diff
        return jnp.sqrt(jnp.sum(d * d, axis=-1, keepdims=True))   # (tb, 1)

    pd_rows = (w["euclidean_distance_fusion_q_weight"] * pdist_rows(fusion, q)
               + w["euclidean_distance_fusion_a_weight"] * pdist_rows(fusion, a)
               + w["euclidean_distance_fusion_v_weight"] * pdist_rows(fusion, v))
    pd_sum = jnp.sum(mask_rows(pd_rows))

    # ---- Fused cycle-KL (one (tb, c) expression, one row-sum) --------------
    # KL(input=log_softmax(x), target=softmax(y)) summed over elements is
    #   sum t_y * (lp_y - lp_x);  fold cycle weights into the per-row softmax
    # scaling so the weight muls land on (tb, 1) scalars.
    log_p_q, e_q, s_q = _log_softmax_parts(q)
    log_p_a, e_a, s_a = _log_softmax_parts(a)
    log_p_v, e_v, s_v = _log_softmax_parts(v)

    w_aq = w["cycle_Kl_loss_weight"] * w["cycle_KL_a_q_weight"]   # input=a, target=q
    w_qv = w["cycle_Kl_loss_weight"] * w["cycle_KL_q_v_weight"]   # input=q, target=v
    w_va = w["cycle_Kl_loss_weight"] * w["cycle_KL_v_a_weight"]   # input=v, target=a

    tq = e_q * (w_aq / s_q)        # exact per-row division (no approx bias)
    tv = e_v * (w_qv / s_v)
    ta = e_a * (w_va / s_a)

    kl_elem = (log_p_q * (tq - tv)
               + log_p_v * (tv - ta)
               + log_p_a * (ta - tq))
    kl_sum = jnp.sum(mask_rows(jnp.sum(kl_elem, axis=-1, keepdims=True)))

    # Per-tile partial (the /B happens in the wrapper reduce).
    out_ref[0, 0] = (w["major_loss_weight"] * ce_sum
                     + w["distribution_loss_weight"] * pd_sum
                     + kl_sum)


def _vmem_capacity_bytes():
    try:
        return int(pltpu.get_tpu_info().vmem_capacity_bytes)
    except Exception:
        return 64 * 1024 * 1024        # conservative: v7x per-core VMEM


def _choose_tile_b(b, c, itemsize):
    cap = _vmem_capacity_bytes()
    budget = int(cap * 0.40)           # leave headroom for compiler scratch
    # Per row of the tile:
    #   * 2x double-buffered pipeline copies of 4 logit streams + label col
    #   * ~12 live full-width f32 temporaries inside the body
    #     (upcasts, exp, log_softmax, scaled targets, fused KL element, ...)
    per_row = 2 * (4 * c * itemsize + 4) + 12 * c * 4
    tb = (budget // per_row) // 8 * 8
    return int(max(8, min(tb, 4096, _round_up(b, 8))))


def mccd_criterion(fusion_logits, q_bias_logits, a_bias_logits, v_bias_logits,
                   label, *, weights=LOSS_WEIGHTS, tile_b=None):
    """Pallas implementation of MCCD_Criterion.forward (three_bias_learner_exist=True)."""
    b, c = fusion_logits.shape
    label_col = label.reshape(-1).astype(jnp.int32).reshape(b, 1)  # label.view(-1)

    itemsize = max(jnp.dtype(x.dtype).itemsize
                   for x in (fusion_logits, q_bias_logits, a_bias_logits, v_bias_logits))
    if tile_b is not None:
        tb = max(8, _round_up(int(tile_b), 8))
    else:
        tb = _choose_tile_b(b, c, itemsize)

    num_tiles = pl.cdiv(b, tb)
    needs_row_mask = (b % tb) != 0

    kernel = functools.partial(_mccd_kernel, tb=tb, batch=b,
                               needs_row_mask=needs_row_mask, w=weights)

    logits_spec = pl.BlockSpec((tb, c), lambda i: (i, 0))
    vmem_limit = min(int(_vmem_capacity_bytes() * 0.5), 100 * 1024 * 1024)

    partials = pl.pallas_call(
        kernel,
        out_shape=jax.ShapeDtypeStruct((num_tiles, 1), jnp.float32),
        grid=(num_tiles,),
        in_specs=[pl.BlockSpec((tb, 1), lambda i: (i, 0)),      # labels (int32)
                  logits_spec, logits_spec, logits_spec, logits_spec],
        out_specs=pl.BlockSpec((1, 1), lambda i: (i, 0),
                               memory_space=pltpu.MemorySpace.SMEM),
        compiler_params=pltpu.CompilerParams(
            dimension_semantics=("parallel",),                  # tiles independent
            vmem_limit_bytes=vmem_limit),
    )(label_col, fusion_logits, q_bias_logits, a_bias_logits, v_bias_logits)

    # Tree-reduce the per-tile partials in the wrapper, then apply the 1/B.
    return jnp.sum(partials) * (1.0 / float(b))


# ---------------------------------------------------------------------------
# Pure-JAX reference (for sanity checking against the kernel).
# ---------------------------------------------------------------------------
def mccd_criterion_ref(fusion, q, a, v, label, *, w=LOSS_WEIGHTS):
    label = label.reshape(-1)
    b, c = fusion.shape
    log_p = jax.nn.log_softmax(fusion, axis=-1)
    ce = -jnp.mean(log_p[jnp.arange(b), label])
    loss = w["major_loss_weight"] * ce

    def pd(x, y):
        d = x - y + _PAIRWISE_EPS
        return jnp.mean(jnp.sqrt(jnp.sum(d * d, axis=-1)))

    loss += w["distribution_loss_weight"] * (
        w["euclidean_distance_fusion_q_weight"] * pd(fusion, q)
        + w["euclidean_distance_fusion_a_weight"] * pd(fusion, a)
        + w["euclidean_distance_fusion_v_weight"] * pd(fusion, v))

    def kl(x, y):
        lp = jax.nn.log_softmax(x, axis=-1)
        lt = jax.nn.log_softmax(y, axis=-1)
        t = jnp.exp(lt)
        return jnp.sum(t * (lt - lp)) / b

    cyc = (w["cycle_KL_a_q_weight"] * kl(a, q)
           + w["cycle_KL_q_v_weight"] * kl(q, v)
           + w["cycle_KL_v_a_weight"] * kl(v, a)) * w["cycle_Kl_loss_weight"]
    return loss + cyc


if __name__ == "__main__":
    # Small but deliberately awkward shapes: batch not a multiple of 8,
    # classes not a multiple of 128 (exercises the partial last block + row
    # masking with NO wrapper-side padding of the logit tensors).
    B, C = 10, 160

    key = jax.random.PRNGKey(0)
    k1, k2, k3, k4, k5 = jax.random.split(key, 5)
    fusion = jax.random.normal(k1, (B, C), dtype=jnp.float32)
    q_bias = jax.random.normal(k2, (B, C), dtype=jnp.float32)
    a_bias = jax.random.normal(k3, (B, C), dtype=jnp.float32)
    v_bias = jax.random.normal(k4, (B, C), dtype=jnp.float32)
    label = jax.random.randint(k5, (B,), 0, C, dtype=jnp.int32)

    ref = jax.block_until_ready(
        mccd_criterion_ref(fusion, q_bias, a_bias, v_bias, label))

    # Single-block path (auto tile: whole batch in one over-hanging tile).
    loss = jax.block_until_ready(
        mccd_criterion(fusion, q_bias, a_bias, v_bias, label))
    assert jnp.allclose(loss, ref, atol=1e-3, rtol=1e-4), (loss, ref)

    # Multi-step grid path (partial last block, per-tile partials, parallel axis).
    loss_tiled = jax.block_until_ready(
        mccd_criterion(fusion, q_bias, a_bias, v_bias, label, tile_b=8))
    assert jnp.allclose(loss_tiled, ref, atol=1e-3, rtol=1e-4), (loss_tiled, ref)

    # bf16-at-the-boundary path (kernel upcasts internally; compare against
    # the reference evaluated on the same quantized inputs).
    fb, qb, ab, vb = (x.astype(jnp.bfloat16) for x in (fusion, q_bias, a_bias, v_bias))
    ref_bf = jax.block_until_ready(
        mccd_criterion_ref(fb.astype(jnp.float32), qb.astype(jnp.float32),
                           ab.astype(jnp.float32), vb.astype(jnp.float32), label))
    loss_bf = jax.block_until_ready(mccd_criterion(fb, qb, ab, vb, label))
    assert jnp.allclose(loss_bf, ref_bf, atol=2e-3, rtol=1e-3), (loss_bf, ref_bf)

    print("KERNEL_OK")
</pallas_src>

<mosaic_0001>
module attributes {stable_mosaic.version = 11 : i64} {
  func.func @_mccd_kernel(%arg0: i32, %arg1: memref<16x1xi32, #tpu.memory_space<vmem>>, %arg2: memref<16x160xf32, #tpu.memory_space<vmem>>, %arg3: memref<16x160xf32, #tpu.memory_space<vmem>>, %arg4: memref<16x160xf32, #tpu.memory_space<vmem>>, %arg5: memref<16x160xf32, #tpu.memory_space<vmem>>, %arg6: memref<1x1xf32, #tpu.memory_space<smem>>) attributes {dimension_semantics = [#tpu.dimension_semantics<parallel>], iteration_bounds = array<i64: 1>, scalar_prefetch = 0 : i64, scratch_operands = 0 : i64, tpu.core_type = #tpu.core_type<tc>, window_params = [{transform_indices = @transform_0, window_bounds = array<i64: 16, 1>}, {transform_indices = @transform_1, window_bounds = array<i64: 16, 160>}, {transform_indices = @transform_2, window_bounds = array<i64: 16, 160>}, {transform_indices = @transform_3, window_bounds = array<i64: 16, 160>}, {transform_indices = @transform_4, window_bounds = array<i64: 16, 160>}, {transform_indices = @transform_5, window_bounds = array<i64: 1, 1>}]} {
    %c0 = arith.constant 0 : index
    %c0_0 = arith.constant 0 : index
    %0 = vector.load %arg2[%c0, %c0_0] : memref<16x160xf32, #tpu.memory_space<vmem>>, vector<16x160xf32>
    %c0_1 = arith.constant 0 : index
    %c0_2 = arith.constant 0 : index
    %1 = vector.load %arg3[%c0_1, %c0_2] : memref<16x160xf32, #tpu.memory_space<vmem>>, vector<16x160xf32>
    %c0_3 = arith.constant 0 : index
    %c0_4 = arith.constant 0 : index
    %2 = vector.load %arg4[%c0_3, %c0_4] : memref<16x160xf32, #tpu.memory_space<vmem>>, vector<16x160xf32>
    %c0_5 = arith.constant 0 : index
    %c0_6 = arith.constant 0 : index
    %3 = vector.load %arg5[%c0_5, %c0_6] : memref<16x160xf32, #tpu.memory_space<vmem>>, vector<16x160xf32>
    %c0_7 = arith.constant 0 : index
    %c0_8 = arith.constant 0 : index
    %4 = vector.load %arg1[%c0_7, %c0_8] : memref<16x1xi32, #tpu.memory_space<vmem>>, vector<16x1xi32>
    %c0_i32 = arith.constant 0 : i32
    %5 = vector.broadcast %c0_i32 : i32 to vector<16x1xi32>
    %6 = arith.cmpi sge, %4, %5 : vector<16x1xi32>
    %c160_i32 = arith.constant 160 : i32
    %7 = vector.broadcast %c160_i32 : i32 to vector<16x1xi32>
    %8 = arith.cmpi slt, %4, %7 : vector<16x1xi32>
    %9 = arith.andi %6, %8 : vector<16x1xi1>
    %10 = tpu.iota {dimensions = array<i32: 0>} : vector<16x1xi32>
    %c16_i32 = arith.constant 16 : i32
    %11 = arith.muli %arg0, %c16_i32 : i32
    %12 = vector.broadcast %11 : i32 to vector<16x1xi32>
    %13 = arith.addi %10, %12 : vector<16x1xi32>
    %c10_i32 = arith.constant 10 : i32
    %14 = vector.broadcast %c10_i32 : i32 to vector<16x1xi32>
    %15 = arith.cmpi slt, %13, %14 : vector<16x1xi32>
    %16 = arith.andi %9, %15 : vector<16x1xi1>
    %cst = arith.constant dense<0xFF800000> : vector<16xf32>
    %17 = vector.multi_reduction <maximumf>, %0, %cst [1] : vector<16x160xf32> to vector<16xf32>
    %18 = vector.shape_cast %17 : vector<16xf32> to vector<16x1xf32>
    %19 = vector.broadcast %18 : vector<16x1xf32> to vector<16x160xf32>
    %20 = arith.subf %0, %19 : vector<16x160xf32>
    %21 = math.exp %20 : vector<16x160xf32>
    %cst_9 = arith.constant dense<0.000000e+00> : vector<16xf32>
    %22 = vector.multi_reduction <add>, %21, %cst_9 [1] : vector<16x160xf32> to vector<16xf32>
    %23 = vector.shape_cast %22 : vector<16xf32> to vector<16x1xf32>
    %24 = tpu.iota {dimensions = array<i32: 1>} : vector<16x160xi32>
    %25 = vector.broadcast %4 : vector<16x1xi32> to vector<16x160xi32>
    %26 = arith.cmpi eq, %24, %25 : vector<16x160xi32>
    %cst_10 = arith.constant 0.000000e+00 : f32
    %27 = vector.broadcast %cst_10 : f32 to vector<16x160xf32>
    %28 = arith.select %26, %0, %27 : vector<16x160xi1>, vector<16x160xf32>
    %cst_11 = arith.constant dense<0.000000e+00> : vector<16xf32>
    %29 = vector.multi_reduction <add>, %28, %cst_11 [1] : vector<16x160xf32> to vector<16xf32>
    %30 = vector.shape_cast %29 : vector<16xf32> to vector<16x1xf32>
    %31 = math.log %23 : vector<16x1xf32>
    %32 = arith.addf %18, %31 : vector<16x1xf32>
    %33 = arith.subf %32, %30 : vector<16x1xf32>
    %cst_12 = arith.constant 0.000000e+00 : f32
    %34 = vector.broadcast %cst_12 : f32 to vector<16x1xf32>
    %35 = arith.select %16, %33, %34 : vector<16x1xi1>, vector<16x1xf32>
    %36 = vector.shape_cast %35 : vector<16x1xf32> to vector<1x16x1xf32>
    %cst_13 = arith.constant dense<0.000000e+00> : vector<1xf32>
    %37 = vector.multi_reduction <add>, %36, %cst_13 [1, 2] : vector<1x16x1xf32> to vector<1xf32>
    %38 = vector.shape_cast %37 : vector<1xf32> to vector<1x1x1xf32>
    %39 = vector.extract %38[0, 0, 0] : f32 from vector<1x1x1xf32>
    %40 = arith.subf %0, %1 : vector<16x160xf32>
    %cst_14 = arith.constant 9.99999997E-7 : f32
    %41 = vector.broadcast %cst_14 : f32 to vector<16x160xf32>
    %42 = arith.addf %40, %41 : vector<16x160xf32>
    %43 = arith.mulf %42, %42 : vector<16x160xf32>
    %cst_15 = arith.constant dense<0.000000e+00> : vector<16xf32>
    %44 = vector.multi_reduction <add>, %43, %cst_15 [1] : vector<16x160xf32> to vector<16xf32>
    %45 = vector.shape_cast %44 : vector<16xf32> to vector<16x1xf32>
    %46 = math.sqrt %45 : vector<16x1xf32>
    %cst_16 = arith.constant 0.333333343 : f32
    %47 = vector.broadcast %cst_16 : f32 to vector<16x1xf32>
    %48 = arith.mulf %47, %46 : vector<16x1xf32>
    %49 = arith.subf %0, %2 : vector<16x160xf32>
    %cst_17 = arith.constant 9.99999997E-7 : f32
    %50 = vector.broadcast %cst_17 : f32 to vector<16x160xf32>
    %51 = arith.addf %49, %50 : vector<16x160xf32>
    %52 = arith.mulf %51, %51 : vector<16x160xf32>
    %cst_18 = arith.constant dense<0.000000e+00> : vector<16xf32>
    %53 = vector.multi_reduction <add>, %52, %cst_18 [1] : vector<16x160xf32> to vector<16xf32>
    %54 = vector.shape_cast %53 : vector<16xf32> to vector<16x1xf32>
    %55 = math.sqrt %54 : vector<16x1xf32>
    %cst_19 = arith.constant 0.333333343 : f32
    %56 = vector.broadcast %cst_19 : f32 to vector<16x1xf32>
    %57 = arith.mulf %56, %55 : vector<16x1xf32>
    %58 = arith.addf %48, %57 : vector<16x1xf32>
    %59 = arith.subf %0, %3 : vector<16x160xf32>
    %cst_20 = arith.constant 9.99999997E-7 : f32
    %60 = vector.broadcast %cst_20 : f32 to vector<16x160xf32>
    %61 = arith.addf %59, %60 : vector<16x160xf32>
    %62 = arith.mulf %61, %61 : vector<16x160xf32>
    %cst_21 = arith.constant dense<0.000000e+00> : vector<16xf32>
    %63 = vector.multi_reduction <add>, %62, %cst_21 [1] : vector<16x160xf32> to vector<16xf32>
    %64 = vector.shape_cast %63 : vector<16xf32> to vector<16x1xf32>
    %65 = math.sqrt %64 : vector<16x1xf32>
    %cst_22 = arith.constant 0.333333343 : f32
    %66 = vector.broadcast %cst_22 : f32 to vector<16x1xf32>
    %67 = arith.mulf %66, %65 : vector<16x1xf32>
    %68 = arith.addf %58, %67 : vector<16x1xf32>
    %cst_23 = arith.constant 0.000000e+00 : f32
    %69 = vector.broadcast %cst_23 : f32 to vector<16x1xf32>
    %70 = arith.select %15, %68, %69 : vector<16x1xi1>, vector<16x1xf32>
    %71 = vector.shape_cast %70 : vector<16x1xf32> to vector<1x16x1xf32>
    %cst_24 = arith.constant dense<0.000000e+00> : vector<1xf32>
    %72 = vector.multi_reduction <add>, %71, %cst_24 [1, 2] : vector<1x16x1xf32> to vector<1xf32>
    %73 = vector.shape_cast %72 : vector<1xf32> to vector<1x1x1xf32>
    %74 = vector.extract %73[0, 0, 0] : f32 from vector<1x1x1xf32>
    %cst_25 = arith.constant dense<0xFF800000> : vector<16xf32>
    %75 = vector.multi_reduction <maximumf>, %1, %cst_25 [1] : vector<16x160xf32> to vector<16xf32>
    %76 = vector.shape_cast %75 : vector<16xf32> to vector<16x1xf32>
    %77 = vector.broadcast %76 : vector<16x1xf32> to vector<16x160xf32>
    %78 = arith.subf %1, %77 : vector<16x160xf32>
    %79 = math.exp %78 : vector<16x160xf32>
    %cst_26 = arith.constant dense<0.000000e+00> : vector<16xf32>
    %80 = vector.multi_reduction <add>, %79, %cst_26 [1] : vector<16x160xf32> to vector<16xf32>
    %81 = vector.shape_cast %80 : vector<16xf32> to vector<16x1xf32>
    %82 = math.log %81 : vector<16x1xf32>
    %83 = vector.broadcast %82 : vector<16x1xf32> to vector<16x160xf32>
    %84 = arith.subf %78, %83 : vector<16x160xf32>
    %cst_27 = arith.constant dense<0xFF800000> : vector<16xf32>
    %85 = vector.multi_reduction <maximumf>, %2, %cst_27 [1] : vector<16x160xf32> to vector<16xf32>
    %86 = vector.shape_cast %85 : vector<16xf32> to vector<16x1xf32>
    %87 = vector.broadcast %86 : vector<16x1xf32> to vector<16x160xf32>
    %88 = arith.subf %2, %87 : vector<16x160xf32>
    %89 = math.exp %88 : vector<16x160xf32>
    %cst_28 = arith.constant dense<0.000000e+00> : vector<16xf32>
    %90 = vector.multi_reduction <add>, %89, %cst_28 [1] : vector<16x160xf32> to vector<16xf32>
    %91 = vector.shape_cast %90 : vector<16xf32> to vector<16x1xf32>
    %92 = math.log %91 : vector<16x1xf32>
    %93 = vector.broadcast %92 : vector<16x1xf32> to vector<16x160xf32>
    %94 = arith.subf %88, %93 : vector<16x160xf32>
    %cst_29 = arith.constant dense<0xFF800000> : vector<16xf32>
    %95 = vector.multi_reduction <maximumf>, %3, %cst_29 [1] : vector<16x160xf32> to vector<16xf32>
    %96 = vector.shape_cast %95 : vector<16xf32> to vector<16x1xf32>
    %97 = vector.broadcast %96 : vector<16x1xf32> to vector<16x160xf32>
    %98 = arith.subf %3, %97 : vector<16x160xf32>
    %99 = math.exp %98 : vector<16x160xf32>
    %cst_30 = arith.constant dense<0.000000e+00> : vector<16xf32>
    %100 = vector.multi_reduction <add>, %99, %cst_30 [1] : vector<16x160xf32> to vector<16xf32>
    %101 = vector.shape_cast %100 : vector<16xf32> to vector<16x1xf32>
    %102 = math.log %101 : vector<16x1xf32>
    %103 = vector.broadcast %102 : vector<16x1xf32> to vector<16x160xf32>
    %104 = arith.subf %98, %103 : vector<16x160xf32>
    %cst_31 = arith.constant 0.166666672 : f32
    %105 = vector.broadcast %cst_31 : f32 to vector<16x1xf32>
    %106 = arith.divf %105, %81 : vector<16x1xf32>
    %107 = vector.broadcast %106 : vector<16x1xf32> to vector<16x160xf32>
    %108 = arith.mulf %79, %107 : vector<16x160xf32>
    %cst_32 = arith.constant 0.166666672 : f32
    %109 = vector.broadcast %cst_32 : f32 to vector<16x1xf32>
    %110 = arith.divf %109, %101 : vector<16x1xf32>
    %111 = vector.broadcast %110 : vector<16x1xf32> to vector<16x160xf32>
    %112 = arith.mulf %99, %111 : vector<16x160xf32>
    %cst_33 = arith.constant 0.166666672 : f32
    %113 = vector.broadcast %cst_33 : f32 to vector<16x1xf32>
    %114 = arith.divf %113, %91 : vector<16x1xf32>
    %115 = vector.broadcast %114 : vector<16x1xf32> to vector<16x160xf32>
    %116 = arith.mulf %89, %115 : vector<16x160xf32>
    %117 = arith.subf %108, %112 : vector<16x160xf32>
    %118 = arith.mulf %84, %117 : vector<16x160xf32>
    %119 = arith.subf %112, %116 : vector<16x160xf32>
    %120 = arith.mulf %104, %119 : vector<16x160xf32>
    %121 = arith.addf %118, %120 : vector<16x160xf32>
    %122 = arith.subf %116, %108 : vector<16x160xf32>
    %123 = arith.mulf %94, %122 : vector<16x160xf32>
    %124 = arith.addf %121, %123 : vector<16x160xf32>
    %cst_34 = arith.constant dense<0.000000e+00> : vector<16xf32>
    %125 = vector.multi_reduction <add>, %124, %cst_34 [1] : vector<16x160xf32> to vector<16xf32>
    %126 = vector.shape_cast %125 : vector<16xf32> to vector<16x1xf32>
    %cst_35 = arith.constant 0.000000e+00 : f32
    %127 = vector.broadcast %cst_35 : f32 to vector<16x1xf32>
    %128 = arith.select %15, %126, %127 : vector<16x1xi1>, vector<16x1xf32>
    %129 = vector.shape_cast %128 : vector<16x1xf32> to vector<1x16x1xf32>
    %cst_36 = arith.constant dense<0.000000e+00> : vector<1xf32>
    %130 = vector.multi_reduction <add>, %129, %cst_36 [1, 2] : vector<1x16x1xf32> to vector<1xf32>
    %131 = vector.shape_cast %130 : vector<1xf32> to vector<1x1x1xf32>
    %132 = vector.extract %131[0, 0, 0] : f32 from vector<1x1x1xf32>
    %cst_37 = arith.constant 1.000000e+00 : f32
    %133 = arith.mulf %cst_37, %39 : f32
    %cst_38 = arith.constant 5.000000e-01 : f32
    %134 = arith.mulf %cst_38, %74 : f32
    %135 = arith.addf %133, %134 : f32
    %136 = arith.addf %135, %132 : f32
    %c0_39 = arith.constant 0 : index
    %c0_40 = arith.constant 0 : index
    %137 = memref.load %arg6[%c0_39, %c0_40] : memref<1x1xf32, #tpu.memory_space<smem>>
    memref.store %136, %arg6[%c0_39, %c0_40] : memref<1x1xf32, #tpu.memory_space<smem>>
    return
  }
  func.func @transform_0(%arg0: i32) -> (i32, i32) {
    %c0_i32 = arith.constant 0 : i32
    %c0_i32_0 = arith.constant 0 : i32
    return %arg0, %c0_i32 : i32, i32
  }
  func.func @transform_1(%arg0: i32) -> (i32, i32) {
    %c0_i32 = arith.constant 0 : i32
    %c0_i32_0 = arith.constant 0 : i32
    return %arg0, %c0_i32 : i32, i32
  }
  func.func @transform_2(%arg0: i32) -> (i32, i32) {
    %c0_i32 = arith.constant 0 : i32
    %c0_i32_0 = arith.constant 0 : i32
    return %arg0, %c0_i32 : i32, i32
  }
  func.func @transform_3(%arg0: i32) -> (i32, i32) {
    %c0_i32 = arith.constant 0 : i32
    %c0_i32_0 = arith.constant 0 : i32
    return %arg0, %c0_i32 : i32, i32
  }
  func.func @transform_4(%arg0: i32) -> (i32, i32) {
    %c0_i32 = arith.constant 0 : i32
    %c0_i32_0 = arith.constant 0 : i32
    return %arg0, %c0_i32 : i32, i32
  }
  func.func @transform_5(%arg0: i32) -> (i32, i32) {
    %c0_i32 = arith.constant 0 : i32
    %c0_i32_0 = arith.constant 0 : i32
    return %arg0, %c0_i32 : i32, i32
  }
}

</mosaic_0001>

<bundles_post_ra>
// kernel: tpu_custom_call.1
= control target key start
LH: loop header
LB: loop body
LE: loop exit
PB: predicated region body
PF: predicated region fallthrough
CT: control target
= control target key end

     0   :  { %10 = vsyncpa [#allocation3], 0  ;;  %s1064_s0 = inlined_call_operand.vmem [shape: s32[10,1], index: 0, kind: input, shape index: {}]   ;;  %s1065_s1 = inlined_call_operand.hbm [shape: f32[10,160], index: 1, kind: input, shape index: {}]   ;;  %s1066_s2 = inlined_call_operand.hbm [shape: f32[10,160], index: 2, kind: input, shape index: {}]   ;;  %s1067_s3 = inlined_call_operand.hbm [shape: f32[10,160], index: 3, kind: input, shape index: {}]   ;;  %s1068_s4 = inlined_call_operand.vmem [shape: f32[10,160], index: 4, kind: input, shape index: {}]   ;;  %s1069_s5 = inlined_call_operand.hbm [shape: f32[1,1], index: 5, kind: output, shape index: {}]  }
   0x1   :  { %11 = vsyncpa [#allocation6], 0 }
   0x2   :  { %12 = vsyncpa [#allocation4], 0  ;;  %s675_s18 = smov [#allocation5]   ;;  %s676_s20 = smov [#allocation2]  }
   0x3   :  { %s32_s19 = sshll.u32 %s675_s18, 4  ;;  %s20_s21 = sshll.u32 %s676_s20, 4  ;;  %s33_s19 = int_to_ptr.vmem [resolvable:$true] %s32_s19  ;;  %s712_s21 = int_to_ptr.vmem [resolvable:$true] %s20_s21 }
   0x4   :  { %s593_s24 = scalar_lea.hbm %s1066_s2, 512 }
   0x5   :  { %p594_p0 = scmp.ne.s32.totalorder %s1066_s2, %s593_s24  ;;  %p597_p1 = scmp.lt.u32.totalorder %s593_s24, %s1066_s2 }
   0x7   :  { %p599_p2 = pnand %p597_p1, %p594_p0 }
   0x9   :  { %602 = shalt.err (!%p599_p2)
}
   0xa   :  { %s603_s29 = scalar_lea.vmem %s33_s19, 512  ;;  %p608_p4 = scmp.lt.s32.totalorder %s33_s19, %s33_s19 }
   0xb   :  { %p604_p3 = scmp.ne.s32.totalorder %s33_s19, %s603_s29  ;;  %p609_p5 = scmp.lt.s32.totalorder %s603_s29, %s603_s29 }
   0xd   :  { %p610_p6 = por %p609_p5, %p608_p4 }
   0xf   :  { %p611_p7 = pnand %p610_p6, %p604_p3 }
  0x11   :  { %614 = shalt.err (!%p611_p7)
}
  0x12   :  { %s677_s30 = smov 256   ;;  %s678_s6 = smov 16  }
  0x13   :  { %38 = dma.hbm_to_vmem [thread:$0]  %s1066_s2, 512, %s33_s19, [#allocation6], %s677_s30, %s677_s30, %s678_s6  }
  0x14   :  { %s615_s11 = scalar_lea.hbm %s1065_s1, 512 }
  0x15   :  { %p616_p8 = scmp.ne.s32.totalorder %s1065_s1, %s615_s11  ;;  %p619_p9 = scmp.lt.u32.totalorder %s615_s11, %s1065_s1 }
  0x17   :  { %p621_p10 = pnand %p619_p9, %p616_p8 }
  0x19   :  { %624 = shalt.err (!%p621_p10)
}
  0x1a   :  { %s625_s16 = scalar_lea.vmem %s712_s21, 512  ;;  %p630_p12 = scmp.lt.s32.totalorder %s712_s21, %s712_s21 }
  0x1b   :  { %p626_p11 = scmp.ne.s32.totalorder %s712_s21, %s625_s16  ;;  %p631_p13 = scmp.lt.s32.totalorder %s625_s16, %s625_s16 }
  0x1d   :  { %p632_p0 = por %p631_p13, %p630_p12 }
  0x1f   :  { %p633_p1 = pnand %p632_p0, %p626_p11 }
  0x21   :  { %636 = shalt.err (!%p633_p1)
}
  0x22   :  { %26 = dma.hbm_to_vmem [thread:$0]  %s1065_s1, 512, %s712_s21, [#allocation3], %s677_s30, %s677_s30, %s678_s6  }
  0x23   :  { %s679_s18 = smov [#allocation7]   ;;  %s637_s23 = scalar_lea.hbm %s1067_s3, 512 }
  0x24   :  { %s44_s19 = sshll.u32 %s679_s18, 4  ;;  %p638_p2 = scmp.ne.s32.totalorder %s1067_s3, %s637_s23  ;;  %s45_s19 = int_to_ptr.vmem [resolvable:$true] %s44_s19 }
  0x25   :  { %p641_p3 = scmp.lt.u32.totalorder %s637_s23, %s1067_s3 }
  0x27   :  { %p643_p4 = pnand %p641_p3, %p638_p2 }
  0x29   :  { %646 = shalt.err (!%p643_p4)
}
  0x2a   :  { %s647_s28 = scalar_lea.vmem %s45_s19, 512  ;;  %p652_p6 = scmp.lt.s32.totalorder %s45_s19, %s45_s19 }
  0x2b   :  { %p648_p5 = scmp.ne.s32.totalorder %s45_s19, %s647_s28  ;;  %p653_p7 = scmp.lt.s32.totalorder %s647_s28, %s647_s28 }
  0x2d   :  { %p654_p8 = por %p653_p7, %p652_p6 }
  0x2f   :  { %p655_p9 = pnand %p654_p8, %p648_p5 }
  0x31   :  { %658 = shalt.err (!%p655_p9)
}
  0x32   :  { %50 = dma.hbm_to_vmem [thread:$0]  %s1067_s3, 512, %s45_s19, [#allocation6], %s677_s30, %s677_s30, %s678_s6  }
  0x33   :  { %669 = dma.done.wait [#allocation3], 512  }
  0x34   :  { %670 = vsyncadd [#allocation3], 4294966784 }
  0x35   :  { %671 = dma.done.wait [#allocation6], 1024  }
  0x36   :  { %672 = vsyncadd [#allocation6], 4294966272  ;;  %vm97_vm0 = vcmask 261120   ;;  %v764_v0 = vld [vmem:[#allocation5 + $0x10] sm:$0xff]  ;;  %v766_v1 = vld [vmem:[#allocation5 + $0x18] sm:$0xff]  ;;  %v680_v32 = vmov 0  }
  0x37   :  { %v771_v2 = vld [vmem:[%s1068_s4 + $0x10] sm:$0xff]  ;;  %v304_v3 = vsel %vm97_vm0, %v766_v1, -inf  ;;  %v778_v4 = vld [vmem:[%s1068_s4 + $0x18] sm:$0xff]  ;;  %v789_v10 = vld [vmem:[#allocation5] sm:$0xff]  ;;  %520 = vset.pattern.permute.xlu1 %v680_v32  ;;  %519 = vset.pattern.permute.xlu0 %v680_v32  ;;  %s659_s20 = scalar_lea.hbm %s1069_s5, 16 }
  0x38   :  { %v780_v5 = vld [vmem:[#allocation7 + $0x10] sm:$0xff]  ;;  %v782_v6 = vld [vmem:[#allocation7 + $0x18] sm:$0xff]  ;;  %v305_v7 = vmax.f32 %v764_v0, %v304_v3  ;;  %v376_v8 = vsel %vm97_vm0, %v778_v4, -inf  ;;  %v791_v11 = vld [vmem:[#allocation5 + $0x8] sm:$0xff]  ;;  %p660_p10 = scmp.ne.s32.totalorder %s1069_s5, %s659_s20  ;;  %p663_p11 = scmp.lt.u32.totalorder %s659_s20, %s1069_s5 }
  0x39   :  { %v340_v9 = vsel %vm97_vm0, %v782_v6, -inf  ;;  %v377_v12 = vmax.f32 %v771_v2, %v376_v8  ;;  %v300_v13 = vsel %vm97_vm0, %v791_v11, -inf  ;;  %v796_v14 = vld [vmem:[#allocation7 + $0x8] sm:$0xff]  ;;  %v805_v18 = vld [vmem:[#allocation7] sm:$0xff]  ;;  %v818_v23 = vld [vmem:[#allocation2 + $0x18] sm:$0xff] }
  0x3a   :  { %v801_v15 = vld [vmem:[%s1068_s4 + $0x8] sm:$0xff]  ;;  %306 = vmax.xlane.f32.xlu0 %v305_v7  ;;  %v341_v16 = vmax.f32 %v780_v5, %v340_v9  ;;  %v301_v17 = vmax.f32 %v789_v10, %v300_v13  ;;  %v336_v19 = vsel %vm97_vm0, %v796_v14, -inf  ;;  %v812_v20 = vld [vmem:[%s1068_s4] sm:$0xff]  ;;  %v826_v28 = vld [vmem:[#allocation2 + $0x10] sm:$0xff]  ;;  %v102_v29 = vsel %vm97_vm0, %v818_v23, -inf  ;;  %p665_p12 = pnand %p663_p11, %p660_p10 }
  0x3b   :  { %378 = vmax.xlane.f32.xlu1 %v377_v12  ;;  %v372_v21 = vsel %vm97_vm0, %v801_v15, -inf  ;;  %v816_v22 = vld [vmem:[#allocation2 + $0x8] sm:$0xff]  ;;  %v337_v24 = vmax.f32 %v805_v18, %v336_v19  ;;  %v822_v26 = vld [vmem:[#allocation2] sm:$0xff]  ;;  %v103_v31 = vmax.f32 %v826_v28, %v102_v29 }
  0x3c   :  { %v373_v25 = vmax.f32 %v812_v20, %v372_v21  ;;  %v98_v27 = vsel %vm97_vm0, %v816_v22, -inf }
  0x3d   :  { %v99_v30 = vmax.f32 %v822_v26, %v98_v27 }
  0x3e   :  { %342 = vmax.xlane.f32.xlu0 %v341_v16 }
  0x3f   :  { %302 = vmax.xlane.f32.xlu1 %v301_v17 }
  0x42   :  { %338 = vmax.xlane.f32.xlu0 %v337_v24 }
  0x43   :  { %374 = vmax.xlane.f32.xlu1 %v373_v25 }
  0x46   :  { %100 = vmax.xlane.f32.xlu0 %v99_v30 }
  0x47   :  { %104 = vmax.xlane.f32.xlu1 %v103_v31 }
  0xc7   :  { %v307_v33 = vpop.xlane.xlu0 %306 }
  0xc8   :  { %v833_v34 = vsub.f32 %v764_v0, %v307_v33  ;;  %v836_v35 = vsub.f32 %v766_v1, %v307_v33  ;;  %v379_v36 = vpop.xlane.xlu1 %378 }
  0xc9   :  { %v839_v37 = vsub.f32 %v771_v2, %v379_v36  ;;  %v842_v38 = vsub.f32 %v778_v4, %v379_v36 }
  0xca   :  { %v316_v39 = vmul.f32 1.442695, %v833_v34  ;;  %v318_v40 = vmul.f32 1.442695, %v836_v35 }
  0xcb   :  { %v388_v41 = vmul.f32 1.442695, %v839_v37  ;;  %v390_v42 = vmul.f32 1.442695, %v842_v38  ;;  %v343_v43 = vpop.xlane.xlu0 %342 }
  0xcc   :  { %521 = vpow2.f32 %v316_v39  ;;  %v849_v44 = vsub.f32 %v780_v5, %v343_v43  ;;  %v852_v45 = vsub.f32 %v782_v6, %v343_v43  ;;  %v303_v46 = vpop.xlane.xlu1 %302  ;;  %v925_v43 = vld [vmem:[%s1064_s0 + $0x8] sm:$0xff] }
  0xcd   :  { %523 = vpow2.f32 %v318_v40  ;;  %v855_v47 = vsub.f32 %v789_v10, %v303_v46  ;;  %v858_v48 = vsub.f32 %v791_v11, %v303_v46  ;;  %v930_v46 = vld [vmem:[%s1064_s0] sm:$0xff] }
  0xce   :  { %525 = vpow2.f32 %v388_v41  ;;  %v352_v49 = vmul.f32 1.442695, %v849_v44  ;;  %v354_v50 = vmul.f32 1.442695, %v852_v45 }
  0xcf   :  { %527 = vpow2.f32 %v390_v42  ;;  %v312_v51 = vmul.f32 1.442695, %v855_v47  ;;  %v314_v52 = vmul.f32 1.442695, %v858_v48  ;;  %v339_v53 = vpop.xlane.xlu0 %338 }
  0xd0   :  { %529 = vpow2.f32 %v352_v49  ;;  %v865_v54 = vsub.f32 %v805_v18, %v339_v53  ;;  %v868_v55 = vsub.f32 %v796_v14, %v339_v53  ;;  %v375_v56 = vpop.xlane.xlu1 %374  ;;  %v213_v49 = vsub.f32 %v818_v23, %v782_v6 }
  0xd1   :  { %531 = vpow2.f32 %v354_v50  ;;  %v871_v57 = vsub.f32 %v812_v20, %v375_v56  ;;  %v874_v58 = vsub.f32 %v801_v15, %v375_v56  ;;  %v177_v50 = vsub.f32 %v818_v23, %v766_v1 }
  0xd2   :  { %533 = vpow2.f32 %v312_v51  ;;  %v348_v59 = vmul.f32 1.442695, %v865_v54  ;;  %v350_v60 = vmul.f32 1.442695, %v868_v55  ;;  %v212_v51 = vsub.f32 %v826_v28, %v780_v5 }
  0xd3   :  { %535 = vpow2.f32 %v314_v52  ;;  %v384_v61 = vmul.f32 1.442695, %v871_v57  ;;  %v386_v62 = vmul.f32 1.442695, %v874_v58  ;;  %v217_v52 = vadd.f32 1e-06, %v213_v49 }
  0xd4   :  { %537 = vpow2.f32 %v348_v59  ;;  %v176_v53 = vsub.f32 %v826_v28, %v764_v0  ;;  %v181_v56 = vadd.f32 1e-06, %v177_v50  ;;  %v175_v59 = vsub.f32 %v816_v22, %v791_v11 }
  0xd5   :  { %539 = vpow2.f32 %v350_v60  ;;  %v216_v60 = vadd.f32 1e-06, %v212_v51  ;;  %v174_v6 = vsub.f32 %v822_v26, %v789_v10  ;;  %v211_v5 = vsub.f32 %v816_v22, %v796_v14 }
  0xd6   :  { %v880_v63 = vpop.eup %521  ;;  %541 = vpow2.f32 %v384_v61  ;;  %v221_v61 = vmul.f32 %v217_v52, %v217_v52  ;;  %v210_v11 = vsub.f32 %v822_v26, %v805_v18  ;;  %v251_v14 = vsub.f32 %v818_v23, %v778_v4 }
  0xd7   :  { %v882_v3 = vpop.eup %523  ;;  %543 = vpow2.f32 %v386_v62  ;;  %v180_v62 = vadd.f32 1e-06, %v176_v53  ;;  %v220_v1 = vmul.f32 %v216_v60, %v216_v60  ;;  %v250_v53 = vsub.f32 %v826_v28, %v771_v2 }
  0xd8   :  { %v884_v7 = vpop.eup %525  ;;  %v324_v8 = vsel %vm97_vm0, %v882_v3, 0.0  ;;  %v226_v0 = vsel %vm97_vm0, %v221_v61, 0.0  ;;  %v214_v50 = vadd.f32 1e-06, %v210_v11  ;;  %v249_v4 = vsub.f32 %v816_v22, %v801_v15 }
  0xd9   :  { %v888_v9 = vpop.eup %527  ;;  %v325_v12 = vadd.f32 %v880_v63, %v324_v8  ;;  %v185_v8 = vmul.f32 %v181_v56, %v181_v56 }
  0xda   :  { %v891_v13 = vpop.eup %529  ;;  %v396_v16 = vsel %vm97_vm0, %v888_v9, 0.0 }
  0xdb   :  { %v895_v17 = vpop.eup %531  ;;  %326 = vadd.xlane.f32.xlu0 %v325_v12  ;;  %v397_v19 = vadd.f32 %v884_v7, %v396_v16  ;;  %v179_v12 = vadd.f32 1e-06, %v175_v59  ;;  %v946_v16 = vpop.xlane.xlu0 %100  ;;  %v255_v59 = vadd.f32 1e-06, %v251_v14 }
  0xdc   :  { %v898_v21 = vpop.eup %533  ;;  %v360_v24 = vsel %vm97_vm0, %v895_v17, 0.0  ;;  %v107_v10 = vsub.f32 %v816_v22, %v946_v16 }
  0xdd   :  { %v902_v25 = vpop.eup %535  ;;  %v361_v27 = vadd.f32 %v891_v13, %v360_v24  ;;  %v178_v24 = vadd.f32 1e-06, %v174_v6  ;;  %v218_v6 = vmul.f32 %v214_v50, %v214_v50 }
  0xde   :  { %v905_v29 = vpop.eup %537  ;;  %v320_v30 = vsel %vm97_vm0, %v902_v25, 0.0  ;;  %v112_v18 = vmul.f32 1.442695, %v107_v10 }
  0xdf   :  { %v909_v31 = vpop.eup %539  ;;  %362 = vadd.xlane.f32.xlu1 %v361_v27  ;;  %398 = vadd.xlane.f32.xlu0 %v397_v19  ;;  %v321_v32 = vadd.f32 %v898_v21, %v320_v30  ;;  %v184_v19 = vmul.f32 %v180_v62, %v180_v62  ;;  %v190_v27 = vsel %vm97_vm0, %v185_v8, 0.0  ;;  %v183_v30 = vmul.f32 %v179_v12, %v179_v12 }
  0xe0   :  { %v912_v33 = vpop.eup %541  ;;  %v356_v36 = vsel %vm97_vm0, %v909_v31, 0.0  ;;  %v182_v49 = vmul.f32 %v178_v24, %v178_v24  ;;  %545 = vpow2.f32 %v112_v18  ;;  %v254_v12 = vadd.f32 1e-06, %v250_v53 }
  0xe1   :  { %v916_v39 = vpop.eup %543  ;;  %v357_v40 = vadd.f32 %v905_v29, %v356_v36  ;;  %v956_v36 = vpop.xlane.xlu1 %104  ;;  %v186_v51 = vsel %vm97_vm0, %v183_v30, 0.0 }
  0xe2   :  { %v392_v41 = vsel %vm97_vm0, %v916_v39, 0.0  ;;  %v109_v52 = vsub.f32 %v818_v23, %v956_v36  ;;  %v187_v61 = vadd.f32 %v186_v51, %v182_v49  ;;  %v108_v62 = vsub.f32 %v826_v28, %v956_v36 }
  0xe3   :  { %322 = vadd.xlane.f32.xlu1 %v321_v32  ;;  %358 = vadd.xlane.f32.xlu0 %v357_v40  ;;  %v393_v42 = vadd.f32 %v912_v33, %v392_v41  ;;  %v227_v32 = vadd.f32 %v226_v0, %v220_v1  ;;  %v215_v40 = vadd.f32 1e-06, %v211_v5  ;;  %v191_v41 = vadd.f32 %v190_v27, %v184_v19 }
  0xe4   :  { %v116_v8 = vmul.f32 1.442695, %v109_v52  ;;  %v248_v1 = vsub.f32 %v822_v26, %v812_v20  ;;  %v259_v5 = vmul.f32 %v255_v59, %v255_v59  ;;  %v253_v0 = vadd.f32 1e-06, %v249_v4 }
  0xe5   :  { %v219_v56 = vmul.f32 %v215_v40, %v215_v40  ;;  %v114_v19 = vmul.f32 1.442695, %v108_v62  ;;  %v258_v24 = vmul.f32 %v254_v12, %v254_v12  ;;  %v86_v4 = vlaneseq }
  0xe6   :  { %v252_v11 = vadd.f32 1e-06, %v248_v1  ;;  %v264_v27 = vsel %vm97_vm0, %v259_v5, 0.0  ;;  %v257_v10 = vmul.f32 %v253_v0, %v253_v0 }
  0xe7   :  { %394 = vadd.xlane.f32.xlu1 %v393_v42  ;;  %v106_v42 = vsub.f32 %v822_v26, %v946_v16  ;;  %v222_v2 = vsel %vm97_vm0, %v219_v56, 0.0  ;;  %v265_v30 = vadd.f32 %v264_v27, %v258_v24  ;;  %v979_v62 = vand.u32 127, %v86_v4 }
  0xe8   :  { %v223_v15 = vadd.f32 %v222_v2, %v218_v6  ;;  %v260_v20 = vsel %vm97_vm0, %v257_v10, 0.0 }
  0xe9   :  { %v110_v60 = vmul.f32 1.442695, %v106_v42  ;;  %v128_v5 = vadd.s32 128, %v979_v62 }
  0xea   :  { %v546_v40 = vpop.eup %545 }
  0xeb   :  { %547 = vpow2.f32 %v110_v60  ;;  %v118_v42 = vsel %vm97_vm0, %v546_v40, 0.0 }
  0xec   :  { %549 = vpow2.f32 %v116_v8 }
  0xed   :  { %551 = vpow2.f32 %v114_v19 }
  0xf8   :  { %133 = vperm.xlu1 %520, %v925_v43  }
  0xf9   :  { %130 = vperm.xlu0 %519, %v930_v46  }
 0x118   :  { %228 = vadd.xlane.f32.xlu0 %v227_v32  ;;  %v256_v32 = vmul.f32 %v252_v11, %v252_v11 }
 0x11a   :  { %v261_v14 = vadd.f32 %v260_v20, %v256_v32 }
 0x11c   :  { %192 = vadd.xlane.f32.xlu1 %v191_v41  ;;  %v548_v41 = vpop.eup %547 }
 0x11d   :  { %v550_v49 = vpop.eup %549  ;;  %v119_v50 = vadd.f32 %v548_v41, %v118_v42 }
 0x11e   :  { %v552_v18 = vpop.eup %551  ;;  %v122_v51 = vsel %vm97_vm0, %v550_v49, 0.0 }
 0x11f   :  { %v123_v52 = vadd.f32 %v552_v18, %v122_v51 }
 0x120   :  { %188 = vadd.xlane.f32.xlu1 %v187_v61 }
 0x124   :  { %224 = vadd.xlane.f32.xlu1 %v223_v15 }
 0x128   :  { %266 = vadd.xlane.f32.xlu1 %v265_v30 }
 0x12c   :  { %262 = vadd.xlane.f32.xlu1 %v261_v14 }
 0x130   :  { %120 = vadd.xlane.f32.xlu1 %v119_v50 }
 0x134   :  { %124 = vadd.xlane.f32.xlu1 %v123_v52 }
 0x168   :  { %v327_v53 = vpop.xlane.xlu0 %326 }
 0x169   :  { %553 = vlog2.f32 %v327_v53 }
 0x16a   :  { %555 = vrcp.f32 %v327_v53 }
 0x16c   :  { %v363_v56 = vpop.xlane.xlu1 %362  ;;  %v399_v59 = vpop.xlane.xlu0 %398 }
 0x16d   :  { %557 = vlog2.f32 %v363_v56 }
 0x16e   :  { %559 = vrcp.f32 %v363_v56 }
 0x16f   :  { %561 = vlog2.f32 %v399_v59 }
 0x170   :  { %563 = vrcp.f32 %v399_v59  ;;  %v323_v60 = vpop.xlane.xlu1 %322  ;;  %v359_v61 = vpop.xlane.xlu0 %358 }
 0x171   :  { %565 = vlog2.f32 %v323_v60 }
 0x172   :  { %567 = vrcp.f32 %v323_v60 }
 0x173   :  { %v554_v6 = vpop.eup %553  ;;  %569 = vlog2.f32 %v359_v61 }
 0x174   :  { %v556_v8 = vpop.eup %555  ;;  %v981_v12 = vmul.f32 0.6931472, %v554_v6  ;;  %571 = vrcp.f32 %v359_v61  ;;  %v395_v1 = vpop.xlane.xlu1 %394 }
 0x175   :  { %v411_v2 = vmul.f32 0.16666667, %v556_v8  ;;  %573 = vlog2.f32 %v395_v1 }
 0x176   :  { %575 = vrcp.f32 %v395_v1  ;;  %v334_v15 = vsub.f32 %v833_v34, %v981_v12  ;;  %v335_v24 = vsub.f32 %v836_v35, %v981_v12 }
 0x177   :  { %v558_v0 = vpop.eup %557  ;;  %v989_v11 = vmul.f32 %v880_v63, %v411_v2  ;;  %v994_v20 = vmul.f32 %v882_v3, %v411_v2 }
 0x178   :  { %v560_v19 = vpop.eup %559  ;;  %v991_v27 = vmul.f32 0.6931472, %v558_v0  ;;  %v134_v10 = vpop.permute.xlu1 %133 }
 0x179   :  { %v131_v30 = vpop.permute.xlu0 %130  ;;  %v562_v32 = vpop.eup %561  ;;  %v427_v40 = vmul.f32 0.16666667, %v560_v19  ;;  %vm137_vm1 = vcmp.eq.s32.totalorder %v979_v62, %v134_v10  ;;  %vm138_vm2 = vcmp.eq.s32.totalorder %v128_v5, %v134_v10 }
 0x17a   :  { %v564_v14 = vpop.eup %563  ;;  %v370_v34 = vsub.f32 %v849_v44, %v991_v27  ;;  %v371_v35 = vsub.f32 %v852_v45, %v991_v27  ;;  %v403_v63 = vmul.f32 0.6931472, %v562_v32  ;;  %vm135_vm3 = vcmp.eq.s32.totalorder %v979_v62, %v131_v30 }
 0x17b   :  { %v566_v41 = vpop.eup %565  ;;  %v430_v42 = vmul.f32 %v891_v13, %v427_v40  ;;  %v419_v49 = vmul.f32 0.16666667, %v564_v14  ;;  %v142_v3 = vsel %vm138_vm2, %v818_v23, 0.0  ;;  %vm136_vm4 = vcmp.eq.s32.totalorder %v128_v5, %v131_v30 }
 0x17c   :  { %v568_v50 = vpop.eup %567  ;;  %v431_v18 = vmul.f32 %v895_v17, %v427_v40  ;;  %v406_v51 = vsub.f32 %v839_v37, %v403_v63  ;;  %v407_v44 = vsub.f32 %v842_v38, %v403_v63  ;;  %v329_v52 = vmul.f32 0.6931472, %v566_v41 }
 0x17d   :  { %v570_v53 = vpop.eup %569  ;;  %v422_v45 = vmul.f32 %v884_v7, %v419_v49  ;;  %v423_v56 = vmul.f32 %v888_v9, %v419_v49  ;;  %v409_v59 = vmul.f32 0.16666667, %v568_v50  ;;  %v140_v13 = vsel %vm136_vm4, %v816_v22, 0.0 }
 0x17e   :  { %v572_v60 = vpop.eup %571  ;;  %v332_v23 = vsub.f32 %v855_v47, %v329_v52  ;;  %v365_v61 = vmul.f32 0.6931472, %v570_v53  ;;  %v141_v17 = vsel %vm137_vm1, %v826_v28, 0.0  ;;  %v147_v37 = vsel %vm97_vm0, %v142_v3, 0.0 }
 0x17f   :  { %v574_v38 = vpop.eup %573  ;;  %v434_v6 = vsub.f32 %v989_v11, %v422_v45  ;;  %v435_v7 = vsub.f32 %v994_v20, %v423_v56  ;;  %v442_v8 = vsub.f32 %v422_v45, %v430_v42  ;;  %v333_v9 = vsub.f32 %v858_v48, %v329_v52 }
 0x180   :  { %v576_v12 = vpop.eup %575  ;;  %v443_v22 = vsub.f32 %v423_v56, %v431_v18  ;;  %v412_v1 = vmul.f32 %v898_v21, %v409_v59  ;;  %v413_v47 = vmul.f32 %v902_v25, %v409_v59  ;;  %v368_v2 = vsub.f32 %v865_v54, %v365_v61 }
 0x181   :  { %v425_v5 = vmul.f32 0.16666667, %v572_v60  ;;  %v401_v28 = vmul.f32 0.6931472, %v574_v38  ;;  %v417_v0 = vmul.f32 0.16666667, %v576_v12  ;;  %v148_v19 = vadd.f32 %v147_v37, %v141_v17 }
 0x182   :  { %v139_v27 = vsel %vm135_vm3, %v822_v26, 0.0  ;;  %v143_v10 = vsel %vm97_vm0, %v140_v13, 0.0  ;;  %v438_v32 = vmul.f32 %v434_v6, %v334_v15  ;;  %v439_v48 = vmul.f32 %v435_v7, %v335_v24 }
 0x183   :  { %v428_v40 = vmul.f32 %v905_v29, %v425_v5  ;;  %v429_v21 = vmul.f32 %v909_v31, %v425_v5  ;;  %v404_v25 = vsub.f32 %v871_v57, %v401_v28  ;;  %v405_v54 = vsub.f32 %v874_v58, %v401_v28  ;;  %149 = vadd.xlane.f32.xlu1 %v148_v19 }
 0x184   :  { %v420_v14 = vmul.f32 %v912_v33, %v417_v0  ;;  %v421_v63 = vmul.f32 %v916_v39, %v417_v0  ;;  %v144_v41 = vadd.f32 %v143_v10, %v139_v27  ;;  %v446_v62 = vmul.f32 %v442_v8, %v406_v51 }
 0x185   :  { %v447_v26 = vmul.f32 %v443_v22, %v407_v44  ;;  %v454_v30 = vsub.f32 %v430_v42, %v989_v11  ;;  %v455_v15 = vsub.f32 %v431_v18, %v994_v20  ;;  %v452_v24 = vsub.f32 %v428_v40, %v412_v1 }
 0x186   :  { %v432_v29 = vsub.f32 %v412_v1, %v420_v14  ;;  %v433_v49 = vsub.f32 %v413_v47, %v421_v63  ;;  %v440_v31 = vsub.f32 %v420_v14, %v428_v40  ;;  %v441_v3 = vsub.f32 %v421_v63, %v429_v21  ;;  %145 = vadd.xlane.f32.xlu0 %v144_v41 }
 0x187   :  { %v450_v57 = vadd.f32 %v446_v62, %v438_v32  ;;  %v451_v58 = vadd.f32 %v447_v26, %v439_v48  ;;  %v458_v50 = vmul.f32 %v454_v30, %v370_v34  ;;  %v459_v52 = vmul.f32 %v455_v15, %v371_v35 }
 0x188   :  { %v436_v33 = vmul.f32 %v432_v29, %v332_v23  ;;  %v437_v53 = vmul.f32 %v433_v49, %v333_v9  ;;  %v444_v39 = vmul.f32 %v440_v31, %v404_v25  ;;  %v445_v45 = vmul.f32 %v441_v3, %v405_v54 }
 0x189   :  { %v369_v51 = vsub.f32 %v868_v55, %v365_v61  ;;  %v462_v44 = vadd.f32 %v458_v50, %v450_v57  ;;  %v463_v11 = vadd.f32 %v459_v52, %v451_v58  ;;  %v453_v42 = vsub.f32 %v429_v21, %v413_v47 }
 0x18a   :  { %v448_v20 = vadd.f32 %v444_v39, %v436_v33  ;;  %v449_v18 = vadd.f32 %v445_v45, %v437_v53  ;;  %v456_v56 = vmul.f32 %v452_v24, %v368_v2  ;;  %v87_v25 = vshrl.u32 %v86_v4, 7 }
 0x18b   :  { %v468_v59 = vsel %vm97_vm0, %v463_v11, 0.0  ;;  %v457_v13 = vmul.f32 %v453_v42, %v369_v51  ;;  %vm161_vm2 = vcmask 7168   ;;  %vm81_vm3 = vcmp.ge.s32.totalorder %v925_v43, 0 }
 0x18c   :  { %v469_v60 = vadd.f32 %v468_v59, %v462_v44  ;;  %v460_v17 = vadd.f32 %v456_v56, %v448_v20  ;;  %v88_v24 = vadd.s32 8, %v87_v25  ;;  %vm83_vm4 = vcmp.lt.s32.totalorder %v925_v43, 160 }
 0x18d   :  { %v461_v37 = vadd.f32 %v457_v13, %v449_v18 }
 0x18e   :  { %470 = vadd.xlane.f32.xlu0 %v469_v60  ;;  %vm94_vm1 = vcmp.lt.s32.totalorder %v88_v24, 10 }
 0x18f   :  { %v464_v34 = vsel %vm97_vm0, %v461_v37, 0.0 }
 0x190   :  { %v465_v35 = vadd.f32 %v464_v34, %v460_v17 }
 0x192   :  { %466 = vadd.xlane.f32.xlu1 %v465_v35 }
 0x1a5   :  { %v229_v23 = vpop.xlane.xlu0 %228 }
 0x1a6   :  { %577 = vrsqrt.f32 %v229_v23  ;;  %vm239_vm6 = vcmp.eq.f32.partialorder %v229_v23, inf  ;;  %vm241_vm7 = vcmp.eq.f32.partialorder %v229_v23, 0.0  ;;  %v242_v47 = vand.u32 2147483648, %v229_v23 }
 0x1a9   :  { %v193_v55 = vpop.xlane.xlu1 %192 }
 0x1aa   :  { %579 = vrsqrt.f32 %v193_v55  ;;  %vm203_vm5 = vcmp.eq.f32.partialorder %v193_v55, inf  ;;  %v206_v1 = vand.u32 2147483648, %v193_v55  ;;  %vm205_vm8 = vcmp.eq.f32.partialorder %v193_v55, 0.0 }
 0x1ad   :  { %v189_v61 = vpop.xlane.xlu1 %188 }
 0x1ae   :  { %581 = vrsqrt.f32 %v189_v61  ;;  %vm196_vm9 = vcmp.eq.f32.partialorder %v189_v61, inf  ;;  %v199_v19 = vand.u32 2147483648, %v189_v61  ;;  %vm198_vm11 = vcmp.eq.f32.partialorder %v189_v61, 0.0 }
 0x1b0   :  { %v578_v6 = vpop.eup %577 }
 0x1b1   :  { %v225_v38 = vpop.xlane.xlu1 %224  ;;  %v238_v12 = vmul.f32 %v578_v6, %v229_v23 }
 0x1b2   :  { %583 = vrsqrt.f32 %v225_v38  ;;  %vm232_vm10 = vcmp.eq.f32.partialorder %v225_v38, inf  ;;  %v235_v10 = vand.u32 2147483648, %v225_v38  ;;  %vm234_vm12 = vcmp.eq.f32.partialorder %v225_v38, 0.0 }
 0x1b3   :  { %v240_v0 = vsel %vm239_vm6, %v229_v23, %v238_v12  ;;  %vm80_vm6 = vcmp.ge.s32.totalorder %v930_v46, 0 }
 0x1b4   :  { %v580_v7 = vpop.eup %579  ;;  %v243_v48 = vsel %vm241_vm7, %v242_v47, %v240_v0  ;;  %vm82_vm7 = vcmp.lt.s32.totalorder %v930_v46, 160 }
 0x1b5   :  { %v202_v8 = vmul.f32 %v580_v7, %v193_v55  ;;  %v267_v9 = vpop.xlane.xlu1 %266  ;;  %v245_v63 = vmul.f32 0.33333334, %v243_v48 }
 0x1b6   :  { %585 = vrsqrt.f32 %v267_v9  ;;  %vm277_vm13 = vcmp.eq.f32.partialorder %v267_v9, inf  ;;  %v280_v62 = vand.u32 2147483648, %v267_v9  ;;  %vm279_vm14 = vcmp.eq.f32.partialorder %v267_v9, 0.0 }
 0x1b7   :  { %v204_v2 = vsel %vm203_vm5, %v193_v55, %v202_v8  ;;  %vm85_vm5 = vmand %vm81_vm3, %vm83_vm4 }
 0x1b8   :  { %v582_v22 = vpop.eup %581  ;;  %v207_v32 = vsel %vm205_vm8, %v206_v1, %v204_v2  ;;  %vm96_vm8 = vmand %vm85_vm5, %vm94_vm1 }
 0x1b9   :  { %v195_v5 = vmul.f32 %v582_v22, %v189_v61  ;;  %v263_v28 = vpop.xlane.xlu1 %262  ;;  %v209_v54 = vmul.f32 0.33333334, %v207_v32 }
 0x1ba   :  { %587 = vrsqrt.f32 %v263_v28  ;;  %vm270_vm15 = vcmp.eq.f32.partialorder %v263_v28, inf  ;;  %v273_v58 = vand.u32 2147483648, %v263_v28  ;;  %vm272_vm0 = vcmp.eq.f32.partialorder %v263_v28, 0.0 }
 0x1bb   :  { %v197_v21 = vsel %vm196_vm9, %v189_v61, %v195_v5  ;;  %v247_v31 = vadd.f32 %v245_v63, %v209_v54  ;;  %vm84_vm9 = vmand %vm80_vm6, %vm82_vm7 }
 0x1bc   :  { %v584_v27 = vpop.eup %583  ;;  %v200_v26 = vsel %vm198_vm11, %v199_v19, %v197_v21 }
 0x1bd   :  { %v231_v40 = vmul.f32 %v584_v27, %v225_v38  ;;  %v208_v29 = vmul.f32 0.33333334, %v200_v26  ;;  %v121_v56 = vpop.xlane.xlu1 %120 }
 0x1bf   :  { %v233_v14 = vsel %vm232_vm10, %v225_v38, %v231_v40 }
 0x1c0   :  { %v586_v41 = vpop.eup %585  ;;  %v236_v30 = vsel %vm234_vm12, %v235_v10, %v233_v14 }
 0x1c1   :  { %v276_v15 = vmul.f32 %v586_v41, %v267_v9  ;;  %v244_v49 = vmul.f32 0.33333334, %v236_v30  ;;  %v125_v59 = vpop.xlane.xlu1 %124 }
 0x1c2   :  { %589 = vlog2.f32 %v125_v59 }
 0x1c3   :  { %v278_v3 = vsel %vm277_vm13, %v267_v9, %v276_v15  ;;  %v246_v33 = vadd.f32 %v244_v49, %v208_v29  ;;  %591 = vlog2.f32 %v121_v56 }
 0x1c4   :  { %v588_v57 = vpop.eup %587  ;;  %v281_v50 = vsel %vm279_vm14, %v280_v62, %v278_v3 }
 0x1c5   :  { %v269_v4 = vmul.f32 %v588_v57, %v263_v28  ;;  %v283_v52 = vmul.f32 0.33333334, %v281_v50 }
 0x1c7   :  { %v271_v53 = vsel %vm270_vm15, %v263_v28, %v269_v4  ;;  %v285_v39 = vadd.f32 %v283_v52, %v247_v31 }
 0x1c8   :  { %v274_v45 = vsel %vm272_vm0, %v273_v58, %v271_v53 }
 0x1c9   :  { %v282_v51 = vmul.f32 0.33333334, %v274_v45  ;;  %v287_v44 = vsel %vm94_vm1, %v285_v39, 0.0 }
 0x1ca   :  { %v289_v42 = vsel %vm161_vm2, %v287_v44, 0.0 }
 0x1cb   :  { %v284_v11 = vadd.f32 %v282_v51, %v246_v33 }
 0x1cc   :  { %v590_v13 = vpop.eup %589 }
 0x1cd   :  { %v288_v20 = vsel %vm161_vm2, %v284_v11, 0.0  ;;  %v592_v60 = vpop.eup %591  ;;  %v154_v17 = vmul.f32 0.6931472, %v590_v13 }
 0x1ce   :  { %v290_v18 = vadd.f32 %v289_v42, %v288_v20  ;;  %v152_v37 = vmul.f32 0.6931472, %v592_v60 }
 0x1cf   :  { %v156_v34 = vadd.f32 %v154_v17, %v956_v36 }
 0x1d0   :  { %291 = vadd.xlane.f32.xlu1 %v290_v18  ;;  %v155_v55 = vadd.f32 %v152_v37, %v946_v16 }
 0x210   :  { %v150_v35 = vpop.xlane.xlu1 %149 }
 0x211   :  { %v158_v23 = vsub.f32 %v156_v34, %v150_v35 }
 0x213   :  { %v160_v61 = vsel %vm96_vm8, %v158_v23, 0.0  ;;  %v146_v38 = vpop.xlane.xlu0 %145 }
 0x214   :  { %v157_v43 = vsub.f32 %v155_v55, %v146_v38  ;;  %v163_v6 = vsel %vm161_vm2, %v160_v61, 0.0 }
 0x216   :  { %v159_v7 = vsel %vm84_vm9, %v157_v43, 0.0 }
 0x217   :  { %v162_v8 = vsel %vm161_vm2, %v159_v7, 0.0 }
 0x218   :  { %v164_v36 = vadd.f32 %v163_v6, %v162_v8 }
 0x21a   :  { %165 = vadd.xlane.f32.xlu0 %v164_v36 }
 0x21b   :  { %v471_v9 = vpop.xlane.xlu0 %470 }
 0x21c   :  { %v473_v46 = vsel %vm94_vm1, %v471_v9, 0.0 }
 0x21d   :  { %v475_v22 = vsel %vm161_vm2, %v473_v46, 0.0 }
 0x21f   :  { %v467_v12 = vpop.xlane.xlu1 %466 }
 0x220   :  { %v474_v1 = vsel %vm161_vm2, %v467_v12, 0.0 }
 0x221   :  { %v476_v16 = vadd.f32 %v475_v22, %v474_v1 }
 0x223   :  { %477 = vadd.xlane.f32.xlu0 %v476_v16 }
 0x25d   :  { %v292_v47 = vpop.xlane.xlu1 %291 }
 0x25e   :  { %v293_v2 = vrot.slane %v292_v47, 4 }
 0x260   :  { %v294_v5 = vadd.f32 %v293_v2, %v292_v47 }
 0x262   :  { %v295_v28 = vrot.slane %v294_v5, 2 }
 0x264   :  { %v296_v10 = vadd.f32 %v295_v28, %v294_v5 }
 0x266   :  { %v297_v40 = vrot.slane %v296_v10, 1 }
 0x268   :  { %v298_v63 = vadd.f32 %v297_v40, %v296_v10 }
 0x2a7   :  { %v166_v0 = vpop.xlane.xlu0 %165 }
 0x2a8   :  { %v167_v19 = vrot.slane %v166_v0, 4 }
 0x2aa   :  { %v168_v27 = vadd.f32 %v167_v19, %v166_v0 }
 0x2ac   :  { %v169_v32 = vrot.slane %v168_v27, 2 }
 0x2ae   :  { %v170_v48 = vadd.f32 %v169_v32, %v168_v27 }
 0x2b0   :  { %v171_v21 = vrot.slane %v170_v48, 1  ;;  %v478_v25 = vpop.xlane.xlu0 %477 }
 0x2b1   :  { %v479_v54 = vrot.slane %v478_v25, 4 }
 0x2b2   :  { %v172_v14 = vadd.f32 %v171_v21, %v170_v48 }
 0x2b3   :  { %v480_v41 = vadd.f32 %v479_v54, %v478_v25 }
 0x2b4   :  { %506 = vpush %v172_v14 }
 0x2b5   :  { %508 = vpush %v298_v63  ;;  %v481_v62 = vrot.slane %v480_v41, 2 }
 0x2b7   :  { %v482_v26 = vadd.f32 %v481_v62, %v480_v41 }
 0x2b9   :  { %v483_v30 = vrot.slane %v482_v26, 1 }
 0x2bb   :  { %v484_v15 = vadd.f32 %v483_v30, %v482_v26 }
 0x2bd   :  { %510 = vpush %v484_v15 }
 0x2e5   :  { %s507_s0 = spop %506 }
 0x2e6   :  { %s509_s14 = spop %508 }
 0x2e7   :  { %s486_s15 = smul.f32 0.5, %s509_s14 }
 0x2e9   :  { %s487_s16 = sadd.f32 %s507_s0, %s486_s15 }
 0x2ee   :  { %s511_s2 = spop %510 }
 0x2ef   :  { %s488_s17 = sadd.f32 %s511_s2, %s487_s16 }
 0x2f1   :  { %490 = sst [smem:[#allocation8]] %s488_s17 }
 0x2f2   :  { %668 = shalt.err (!%p665_p12)
}
 0x2f3   :  { %s681_s26 = smov [#allocation8]  }
 0x2f4   :  { %498 = dma.smem_to_hbm %s681_s26, 16, %s1069_s5, [#allocation4]  }
 0x2f5   :  { %673 = dma.done.wait [#allocation4], 16  }
 0x2f6   :  { %674 = vsyncadd [#allocation4], 4294967280 }
 0x2f7   :  { %502 = sfence }
 0x2f8   :  { %503 = vsyncpa [#allocation3], 1 }
 0x2f9   :  { %504 = vsyncpa [#allocation6], 1 }
 0x2fa   :  { %505 = vsyncpa [#allocation4], 1 }

</bundles_post_ra>
